<compile_context>
chip_gen: v5e
topology: v5e:2x2
jax: 0.10.0
libtpu: 0.0.40
codegen_flags: <defaults>
</compile_context>

<pallas_src>
import functools

import jax
import jax.numpy as jnp
from jax.experimental import pallas as pl
from jax.experimental.pallas import tpu as pltpu


_NEG_FILL = -10000000.0      # fill value used by the reference module
_MASK_DTYPE = jnp.bfloat16   # narrow mask dtype ({0,1} exact in bf16)


def _round_up(x, m):
    return ((x + m - 1) // m) * m


def _round_down(x, m):
    return (x // m) * m


def _num_tensorcores():
    """Best-effort TensorCore count of device 0 (megacore / v7x); 1 if unknown."""
    try:
        info = pltpu.get_tpu_info()
        for attr in ("num_cores", "core_count", "num_tensorcores"):
            v = getattr(info, attr, None)
            if v:
                return max(1, int(v))
    except Exception:
        pass
    try:
        v = getattr(jax.devices()[0], "num_cores", None)
        if v:
            return max(1, int(v))
    except Exception:
        pass
    return 1


def _pooling_kernel(x_ref, m_ref, avg_ref, max_ref, sum_acc, max_acc, *,
                    inv_L, has_tail):
    # x_ref: (TB, TL, D), m_ref: (TB, TL, 1) in {0,1}
    # avg_ref / max_ref: (TB, D) outputs, resident across the L-chunk axis
    # sum_acc / max_acc: (TB, D) float32 scratch accumulators
    k = pl.program_id(1)

    @pl.when(k == 0)
    def _():
        sum_acc[...] = jnp.zeros_like(sum_acc)
        max_acc[...] = jnp.full_like(max_acc, _NEG_FILL)

    x = x_ref[...]
    # bf16 inputs: keep elementwise math in bf16 (native VPU on v6e/v7x),
    # accumulate in f32.  Everything else computes in f32.
    compute_dtype = x.dtype if x.dtype == jnp.bfloat16 else jnp.float32
    x = x.astype(compute_dtype)

    if has_tail:
        # The last L-chunk of x carries unspecified VMEM padding (possibly
        # NaN/Inf).  The mask was zero-padded in HBM, so a boolean select keyed
        # on it is garbage-safe: padded x values never enter any arithmetic.
        cond = m_ref[...] > 0                                # (TB, TL, 1) bool
        masked = jnp.where(cond, x, 0.0)                     # (TB, TL, D)
        filled = jnp.where(cond, x, _NEG_FILL)
    else:
        # Additive-mask trick: exact for a strictly {0,1} mask
        # (m==1 -> +0, m==0 -> -1e7); avoids a second broadcast+select per vreg.
        m = m_ref[...].astype(compute_dtype)                 # (TB, TL, 1)
        masked = x * m
        filled = masked + (m - 1.0) * (-_NEG_FILL)

    sum_acc[...] += masked.astype(jnp.float32).sum(axis=1)               # (TB, D)
    max_acc[...] = jnp.maximum(max_acc[...],
                               jnp.max(filled, axis=1).astype(jnp.float32))

    @pl.when(k == pl.num_programs(1) - 1)
    def _():
        avg_ref[...] = (sum_acc[...] * inv_L).astype(avg_ref.dtype)  # mean over L
        max_ref[...] = max_acc[...].astype(max_ref.dtype)


def _choose_tiles(B, L, D, x_itemsize, m_itemsize, *, per_step_budget, cores):
    """Pick (TB, TL): batch rows and sequence positions per grid step.

    Per-buffer VMEM cost of one step's inputs is
        TB * TL * (round_up(D,128)*x_itemsize + 128*m_itemsize)
    -- the (TB, TL, 1) mask tile is lane-padded 1 -> 128, a substantial
    fraction of the x tile at D=128; both are double-buffered.
    """
    d_pad = _round_up(D, 128)
    row_bytes = d_pad * x_itemsize + 128 * m_itemsize
    # Sublane granularity for the tiled axes (8 for f32, 16 for bf16 operands).
    g = max(32 // x_itemsize, 32 // m_itemsize)

    full_rows = per_step_budget // max(1, L * row_bytes)
    if full_rows >= min(B, g):
        # Whole sequence per step.
        tl = L
        tb = min(B, max(1, full_rows))
    else:
        # Chunk L so that at least g batch rows fit per step; TL multiple of g.
        tl = max(g, _round_down(per_step_budget // (g * row_bytes), g))
        tb = min(B, max(1, per_step_budget // (tl * row_bytes)))

    # Multi-TensorCore chips only (v7x / megacore): shard the parallel batch
    # axis across cores, but never shrink the per-step tile below ~2 MiB.
    if cores > 1 and B > g:
        target_blocks = min(B // g, 2 * cores)
        if target_blocks >= 2:
            tb_split = _round_up(-(-B // target_blocks), g)
            min_rows = max(g, (2 << 20) // max(1, tl * row_bytes))
            tb = min(tb, max(tb_split, min_rows))

    # Align TB: the (TB, D) output blocks put TB on the sublane axis, so TB
    # must be a multiple of the sublane granularity or the full batch.
    if tb >= B:
        tb = B
    else:
        tb = max(g, _round_down(tb, g))
        if tb >= B:
            tb = B
    return tb, tl


def pooling(x, x_mask, *, per_step_budget=12 << 20):
    """x: (B, L, D), x_mask: (B, L) of {0,1} -> (B, 2D) = [masked mean | masked max]."""
    B, L, D = x.shape
    x_itemsize = jnp.dtype(x.dtype).itemsize
    m_itemsize = jnp.dtype(_MASK_DTYPE).itemsize

    cores = _num_tensorcores()
    tb, tl = _choose_tiles(B, L, D, x_itemsize, m_itemsize,
                           per_step_budget=per_step_budget, cores=cores)
    nb = pl.cdiv(B, tb)
    nl = pl.cdiv(L, tl)
    has_tail = (L % tl) != 0

    # Narrow mask dtype; zero-pad the (tiny) mask so every mask block is fully
    # in-bounds -- the kernel's select path then excludes x's padded tail rows.
    m = x_mask.astype(_MASK_DTYPE).reshape(B, L, 1)
    if has_tail:
        m = jnp.pad(m, ((0, 0), (0, nl * tl - L), (0, 0)))

    kernel = functools.partial(_pooling_kernel, inv_L=1.0 / L, has_tail=has_tail)

    # VMEM accounting (double-buffered inputs; lane/sublane-padded footprints).
    g_x = 32 // x_itemsize
    g_m = 32 // m_itemsize
    x_tile = tb * _round_up(tl, g_x) * _round_up(D, 128) * x_itemsize
    m_tile = tb * _round_up(tl, g_m) * 128 * m_itemsize          # 1 -> 128 lanes
    out_tiles = 2 * 2 * _round_up(tb, g_x) * _round_up(D, 128) * x_itemsize
    scratch = 2 * _round_up(tb, 8) * _round_up(D, 128) * 4
    vmem_needed = 2 * (x_tile + m_tile) + out_tiles + scratch
    # Clamp to [32 MiB, 48 MiB]: raises v5e's 16 MiB default, stays well under
    # v7x's 64 MiB physical VMEM.
    vmem_limit = int(min(48 << 20, max(32 << 20, vmem_needed + (4 << 20))))

    avg, vmax = pl.pallas_call(
        kernel,
        out_shape=(jax.ShapeDtypeStruct((B, D), x.dtype),
                   jax.ShapeDtypeStruct((B, D), x.dtype)),
        grid_spec=pltpu.PrefetchScalarGridSpec(
            num_scalar_prefetch=0,
            grid=(nb, nl),
            in_specs=[
                pl.BlockSpec((tb, tl, D), lambda b, k: (b, k, 0)),
                pl.BlockSpec((tb, tl, 1), lambda b, k: (b, k, 0)),
            ],
            # Same output block for every k -> resident accumulator outputs
            # (sublane-dense (tb, D) slabs, unmasked stores).
            out_specs=[
                pl.BlockSpec((tb, D), lambda b, k: (b, 0)),
                pl.BlockSpec((tb, D), lambda b, k: (b, 0)),
            ],
            scratch_shapes=[
                pltpu.VMEM((tb, D), jnp.float32),   # running sum
                pltpu.VMEM((tb, D), jnp.float32),   # running max
            ],
        ),
        compiler_params=pltpu.CompilerParams(
            dimension_semantics=("parallel", "arbitrary"),
            vmem_limit_bytes=vmem_limit,
        ),
        cost_estimate=pl.CostEstimate(
            flops=4 * B * L * D,
            transcendentals=0,
            bytes_accessed=(B * L * D * x_itemsize
                            + B * nl * tl * m_itemsize
                            + 2 * B * D * x_itemsize),
        ),
    )(x, m)

    # [0:D] = v_avg, [D:2D] = v_max (tiny concat relative to the streamed input).
    return jnp.concatenate([avg, vmax], axis=-1)


def pooling_ref(x, x_mask):
    mask_expand = x_mask[..., None].astype(x.dtype)
    v_avg = (x * mask_expand).mean(axis=1)
    filled = jnp.where(mask_expand == 0, jnp.full_like(x, _NEG_FILL), x)
    v_max = filled.max(axis=1)
    return jnp.concatenate([v_avg, v_max], axis=-1)


if __name__ == "__main__":
    key = jax.random.PRNGKey(0)
    k1, k2, k3, k4 = jax.random.split(key, 4)

    # Test 1: small shapes, whole sequence per step (additive-mask fast path).
    B, L, D = 4, 16, 128
    x = jax.random.normal(k1, (B, L, D), dtype=jnp.float32)
    x_mask = (jax.random.uniform(k2, (B, L)) > 0.3).astype(jnp.float32)
    out = pooling(x, x_mask)
    jax.block_until_ready(out)
    ref = pooling_ref(x, x_mask)
    assert out.shape == (B, 2 * D)
    assert jnp.allclose(out, ref, atol=1e-5, rtol=1e-5)

    # Test 2: tiny forced budget -> L-chunking with a tail chunk and a partial
    # batch block (exercises the garbage-safe select path + accumulators).
    B2, L2, D2 = 24, 20, 128
    x2 = jax.random.normal(k3, (B2, L2, D2), dtype=jnp.float32)
    m2 = (jax.random.uniform(k4, (B2, L2)) > 0.3).astype(jnp.float32)
    out2 = pooling(x2, m2, per_step_budget=200_000)
    jax.block_until_ready(out2)
    ref2 = pooling_ref(x2, m2)
    assert out2.shape == (B2, 2 * D2)
    assert jnp.allclose(out2, ref2, atol=1e-5, rtol=1e-5)

    print("KERNEL_OK")
</pallas_src>

<mosaic_0001>
module attributes {stable_mosaic.version = 11 : i64} {
  func.func @_pooling_kernel(%arg0: i32, %arg1: i32, %arg2: memref<4x16x128xf32, #tpu.memory_space<vmem>>, %arg3: memref<4x16x1xbf16, #tpu.memory_space<vmem>>, %arg4: memref<4x128xf32, #tpu.memory_space<vmem>>, %arg5: memref<4x128xf32, #tpu.memory_space<vmem>>, %arg6: memref<4x128xf32, #tpu.memory_space<vmem>>, %arg7: memref<4x128xf32, #tpu.memory_space<vmem>>) attributes {dimension_semantics = [#tpu.dimension_semantics<parallel>, #tpu.dimension_semantics<arbitrary>], iteration_bounds = array<i64: 1, 1>, scalar_prefetch = 0 : i64, scratch_operands = 2 : i64, tpu.core_type = #tpu.core_type<tc>, window_params = [{transform_indices = @transform_0, window_bounds = array<i64: 4, 16, 128>}, {transform_indices = @transform_1, window_bounds = array<i64: 4, 16, 1>}, {transform_indices = @transform_2, window_bounds = array<i64: 4, 128>}, {transform_indices = @transform_3, window_bounds = array<i64: 4, 128>}]} {
    %c0_i32 = arith.constant 0 : i32
    %0 = arith.cmpi eq, %arg1, %c0_i32 : i32
    %1 = arith.extui %0 : i1 to i32
    %c0_i32_0 = arith.constant 0 : i32
    %2 = arith.cmpi ne, %1, %c0_i32_0 : i32
    scf.if %2 {
      %cst_19 = arith.constant 0.000000e+00 : f32
      %25 = vector.broadcast %cst_19 : f32 to vector<4x128xf32>
      %c0_20 = arith.constant 0 : index
      %c0_21 = arith.constant 0 : index
      %26 = vector.load %arg6[%c0_20, %c0_21] : memref<4x128xf32, #tpu.memory_space<vmem>>, vector<4x128xf32>
      tpu.vector_store %arg6[%c0_20, %c0_21], %25 {strides = array<i32>} : memref<4x128xf32, #tpu.memory_space<vmem>>, vector<4x128xf32>,
      %cst_22 = arith.constant -1.000000e+07 : f32
      %27 = vector.broadcast %cst_22 : f32 to vector<4x128xf32>
      %c0_23 = arith.constant 0 : index
      %c0_24 = arith.constant 0 : index
      %28 = vector.load %arg7[%c0_23, %c0_24] : memref<4x128xf32, #tpu.memory_space<vmem>>, vector<4x128xf32>
      tpu.vector_store %arg7[%c0_23, %c0_24], %27 {strides = array<i32>} : memref<4x128xf32, #tpu.memory_space<vmem>>, vector<4x128xf32>,
    } else {
    }
    %c0 = arith.constant 0 : index
    %c0_1 = arith.constant 0 : index
    %c0_2 = arith.constant 0 : index
    %3 = vector.load %arg2[%c0, %c0_1, %c0_2] : memref<4x16x128xf32, #tpu.memory_space<vmem>>, vector<4x16x128xf32>
    %c0_3 = arith.constant 0 : index
    %c0_4 = arith.constant 0 : index
    %c0_5 = arith.constant 0 : index
    %4 = vector.load %arg3[%c0_3, %c0_4, %c0_5] : memref<4x16x1xbf16, #tpu.memory_space<vmem>>, vector<4x16x1xbf16>
    %5 = arith.extf %4 : vector<4x16x1xbf16> to vector<4x16x1xf32>
    %6 = vector.broadcast %5 : vector<4x16x1xf32> to vector<4x16x128xf32>
    %7 = arith.mulf %3, %6 : vector<4x16x128xf32>
    %cst = arith.constant 1.000000e+00 : f32
    %8 = vector.broadcast %cst : f32 to vector<4x16x1xf32>
    %9 = arith.subf %5, %8 : vector<4x16x1xf32>
    %cst_6 = arith.constant 1.000000e+07 : f32
    %10 = vector.broadcast %cst_6 : f32 to vector<4x16x1xf32>
    %11 = arith.mulf %9, %10 : vector<4x16x1xf32>
    %12 = vector.broadcast %11 : vector<4x16x1xf32> to vector<4x16x128xf32>
    %13 = arith.addf %7, %12 : vector<4x16x128xf32>
    %c0_7 = arith.constant 0 : index
    %c0_8 = arith.constant 0 : index
    %14 = vector.load %arg6[%c0_7, %c0_8] : memref<4x128xf32, #tpu.memory_space<vmem>>, vector<4x128xf32>
    %cst_9 = arith.constant dense<0.000000e+00> : vector<4x128xf32>
    %15 = vector.multi_reduction <add>, %7, %cst_9 [1] : vector<4x16x128xf32> to vector<4x128xf32>
    %16 = arith.addf %14, %15 : vector<4x128xf32>
    %c0_10 = arith.constant 0 : index
    %c0_11 = arith.constant 0 : index
    %17 = vector.load %arg6[%c0_10, %c0_11] : memref<4x128xf32, #tpu.memory_space<vmem>>, vector<4x128xf32>
    tpu.vector_store %arg6[%c0_10, %c0_11], %16 {strides = array<i32>} : memref<4x128xf32, #tpu.memory_space<vmem>>, vector<4x128xf32>,
    %c0_12 = arith.constant 0 : index
    %c0_13 = arith.constant 0 : index
    %18 = vector.load %arg7[%c0_12, %c0_13] : memref<4x128xf32, #tpu.memory_space<vmem>>, vector<4x128xf32>
    %cst_14 = arith.constant dense<0xFF800000> : vector<4x128xf32>
    %19 = vector.multi_reduction <maximumf>, %13, %cst_14 [1] : vector<4x16x128xf32> to vector<4x128xf32>
    %20 = arith.maximumf %18, %19 : vector<4x128xf32>
    %c0_15 = arith.constant 0 : index
    %c0_16 = arith.constant 0 : index
    %21 = vector.load %arg7[%c0_15, %c0_16] : memref<4x128xf32, #tpu.memory_space<vmem>>, vector<4x128xf32>
    tpu.vector_store %arg7[%c0_15, %c0_16], %20 {strides = array<i32>} : memref<4x128xf32, #tpu.memory_space<vmem>>, vector<4x128xf32>,
    %c0_i32_17 = arith.constant 0 : i32
    %22 = arith.cmpi eq, %arg1, %c0_i32_17 : i32
    %23 = arith.extui %22 : i1 to i32
    %c0_i32_18 = arith.constant 0 : i32
    %24 = arith.cmpi ne, %23, %c0_i32_18 : i32
    scf.if %24 {
      %c0_19 = arith.constant 0 : index
      %c0_20 = arith.constant 0 : index
      %25 = vector.load %arg6[%c0_19, %c0_20] : memref<4x128xf32, #tpu.memory_space<vmem>>, vector<4x128xf32>
      %cst_21 = arith.constant 6.250000e-02 : f32
      %26 = vector.broadcast %cst_21 : f32 to vector<4x128xf32>
      %27 = arith.mulf %25, %26 : vector<4x128xf32>
      %c0_22 = arith.constant 0 : index
      %c0_23 = arith.constant 0 : index
      %28 = vector.load %arg4[%c0_22, %c0_23] : memref<4x128xf32, #tpu.memory_space<vmem>>, vector<4x128xf32>
      tpu.vector_store %arg4[%c0_22, %c0_23], %27 {strides = array<i32>} : memref<4x128xf32, #tpu.memory_space<vmem>>, vector<4x128xf32>,
      %c0_24 = arith.constant 0 : index
      %c0_25 = arith.constant 0 : index
      %29 = vector.load %arg7[%c0_24, %c0_25] : memref<4x128xf32, #tpu.memory_space<vmem>>, vector<4x128xf32>
      %c0_26 = arith.constant 0 : index
      %c0_27 = arith.constant 0 : index
      %30 = vector.load %arg5[%c0_26, %c0_27] : memref<4x128xf32, #tpu.memory_space<vmem>>, vector<4x128xf32>
      tpu.vector_store %arg5[%c0_26, %c0_27], %29 {strides = array<i32>} : memref<4x128xf32, #tpu.memory_space<vmem>>, vector<4x128xf32>,
    } else {
    }
    return
  }
  func.func @transform_0(%arg0: i32, %arg1: i32) -> (i32, i32, i32) {
    %c0_i32 = arith.constant 0 : i32
    %c0_i32_0 = arith.constant 0 : i32
    return %arg0, %arg1, %c0_i32 : i32, i32, i32
  }
  func.func @transform_1(%arg0: i32, %arg1: i32) -> (i32, i32, i32) {
    %c0_i32 = arith.constant 0 : i32
    %c0_i32_0 = arith.constant 0 : i32
    return %arg0, %arg1, %c0_i32 : i32, i32, i32
  }
  func.func @transform_2(%arg0: i32, %arg1: i32) -> (i32, i32) {
    %c0_i32 = arith.constant 0 : i32
    %c0_i32_0 = arith.constant 0 : i32
    return %arg0, %c0_i32 : i32, i32
  }
  func.func @transform_3(%arg0: i32, %arg1: i32) -> (i32, i32) {
    %c0_i32 = arith.constant 0 : i32
    %c0_i32_0 = arith.constant 0 : i32
    return %arg0, %c0_i32 : i32, i32
  }
}

</mosaic_0001>

<bundles_post_ra>
// kernel: tpu_custom_call.1
= control target key start
LH: loop header
LB: loop body
LE: loop exit
PB: predicated region body
PF: predicated region fallthrough
CT: control target
= control target key end

     0   :  { %9 = vsyncpa [#allocation5], 0  ;;  %s486_s0 = inlined_call_operand.hbm [shape: f32[4,16,128], index: 0, kind: input, shape index: {}]   ;;  %s487_s1 = inlined_call_operand.vmem [shape: bf16[4,16,1], index: 1, kind: input, shape index: {}]   ;;  %s488_s2 = inlined_call_operand.hbm [shape: f32[4,128], index: 2, kind: output, shape index: {0}]   ;;  %s489_s3 = inlined_call_operand.hbm [shape: f32[4,128], index: 3, kind: output, shape index: {1}]  }
   0x1   :  { %10 = vsyncpa [#allocation6], 0 }
   0x2   :  { %11 = vsyncpa [#allocation9], 0  ;;  %s16_s14 = sshll.u32 %s486_s0, 4  ;;  %s431_s15 = smov [#allocation4]   ;;  %s17_s14 = int_to_ptr.hbm [resolvable:$true] %s16_s14 }
   0x3   :  { %s18_s16 = sshll.u32 %s431_s15, 4  ;;  %s432_s17 = smov 128   ;;  %s19_s16 = int_to_ptr.vmem [resolvable:$true] %s18_s16 }
   0x4   :  { %s433_s18 = smov 8  }
   0x5   :  { %24 = dma.hbm_to_vmem [thread:$0]  %s17_s14, 1024, %s19_s16, [#allocation5], %s432_s17, %s432_s17, %s433_s18  }
   0x6   :  { %425 = dma.done.wait [#allocation5], 1024  }
   0x7   :  { %426 = vsyncadd [#allocation5], 4294966272  ;;  %v434_v0 = vmov 0   ;;  %v320_v1 = vld [vmem:[%s487_s1 + $0x10] sm:$0xff]   ;;  %v304_v2 = vld [vmem:[%s487_s1] sm:$0xff]   ;;  %v435_v33 = vmov 0.0  }
   0x8   :  { %341 = vset.pattern.permute.xlu1 %v434_v0  ;;  %330 = vset.pattern.permute.xlu0 %v434_v0  ;;  %v313_v3 = vunpack.c.l.bf16 %v320_v1  ;;  %v314_v4 = vunpack.c.h.bf16 %v320_v1  ;;  %v305_v5 = vunpack.c.l.bf16 %v304_v2  ;;  %v306_v6 = vunpack.c.h.bf16 %v304_v2  ;;  %v321_v7 = vld [vmem:[%s487_s1 + $0x18] sm:$0xff]   ;;  %v319_v8 = vld [vmem:[%s487_s1 + $0x8] sm:$0xff]   ;;  %35 = vst [vmem:[#allocation2] sm:$0xf] %v435_v33  ;;  %v38_v39 = vld [vmem:[#allocation4 + $0x8] sm:$0xff]  ;;  %s437_s1 = smov [#allocation7]  }
   0x9   :  { %352 = vset.pattern.permute.xlu2 %v434_v0  ;;  %v317_v12 = vunpack.c.l.bf16 %v321_v7  ;;  %v318_v14 = vunpack.c.h.bf16 %v321_v7  ;;  %v309_v15 = vunpack.c.l.bf16 %v319_v8  ;;  %v310_v16 = vunpack.c.h.bf16 %v319_v8  ;;  %v41_v36 = vld [vmem:[#allocation4 + $0x20] sm:$0xff]  ;;  %v42_v44 = vld [vmem:[#allocation4 + $0x28] sm:$0xff]  ;;  %v44_v55 = vld [vmem:[#allocation4 + $0x38] sm:$0xff]  ;;  %s267_s26 = sshll.u32 %s437_s1, 4  ;;  %s269_s29 = sshll.u32 %s488_s2, 4  ;;  %s268_s26 = int_to_ptr.vmem [resolvable:$true] %s267_s26  ;;  %s270_s29 = int_to_ptr.hbm [resolvable:$true] %s269_s29 }
   0xa   :  { %v342_v9 = vpack.i.bf16 %v314_v4, %v313_v3  ;;  %v331_v10 = vpack.i.bf16 %v306_v6, %v305_v5  ;;  %v295_v11 = vadd.f32 -1.0, %v305_v5  ;;  %v296_v17 = vadd.f32 -1.0, %v306_v6  ;;  %v37_v38 = vld [vmem:[#allocation4] sm:$0xff]  ;;  %v43_v57 = vld [vmem:[#allocation4 + $0x30] sm:$0xff]  ;;  %v40_v62 = vld [vmem:[#allocation4 + $0x18] sm:$0xff]  ;;  %s438_s30 = smov [#allocation8]  }
   0xb   :  { %v347_v18 = vpack.i.bf16 %v318_v14, %v317_v12  ;;  %v336_v19 = vpack.i.bf16 %v310_v16, %v309_v15  ;;  %v298_v21 = vadd.f32 -1.0, %v310_v16  ;;  %v297_v22 = vadd.f32 -1.0, %v309_v15  ;;  %v39_v63 = vld [vmem:[#allocation4 + $0x10] sm:$0xff]  ;;  %s278_s4 = sshll.u32 %s438_s30, 4  ;;  %s280_s6 = sshll.u32 %s489_s3, 4  ;;  %s279_s4 = int_to_ptr.vmem [resolvable:$true] %s278_s4  ;;  %s281_s6 = int_to_ptr.hbm [resolvable:$true] %s280_s6 }
   0xc   :  { %343 = vperm.xlu1 %341, %v342_v9   ;;  %332 = vperm.xlu0 %330, %v331_v10   ;;  %v117_v13 = vmul.f32 10000000.0, %v295_v11  ;;  %v118_v20 = vmul.f32 10000000.0, %v296_v17  ;;  %v299_v23 = vadd.f32 -1.0, %v313_v3  ;;  %v301_v27 = vadd.f32 -1.0, %v317_v12 }
   0xd   :  { %v120_v24 = vmul.f32 10000000.0, %v298_v21  ;;  %v119_v25 = vmul.f32 10000000.0, %v297_v22  ;;  %v300_v28 = vadd.f32 -1.0, %v314_v4  ;;  %v302_v29 = vadd.f32 -1.0, %v318_v14 }
   0xe   :  { %127 = vperm.xlu2 %352, %v117_v13   ;;  %v121_v26 = vmul.f32 10000000.0, %v299_v23  ;;  %v123_v30 = vmul.f32 10000000.0, %v301_v27  ;;  %v436_v49 = vmov -10000000.0  }
   0xf   :  { %v122_v31 = vmul.f32 10000000.0, %v300_v28  ;;  %v124_v32 = vmul.f32 10000000.0, %v302_v29  ;;  %36 = vst [vmem:[#allocation3] sm:$0xf] %v436_v49 }
  0x10   :  { %vm206_vm0 = vcmask 1041409   ;;  %vm208_vm1 = vcmask 1042434   ;;  %vm210_vm2 = vcmask 1043459  }
  0x14   :  { %348 = vperm.xlu1 %341, %v347_v18   ;;  %337 = vperm.xlu0 %330, %v336_v19  }
  0x16   :  { %132 = vperm.xlu2 %352, %v118_v20  }
  0x1c   :  { %142 = vperm.xlu1 %341, %v120_v24   ;;  %137 = vperm.xlu0 %330, %v119_v25  }
  0x1e   :  { %147 = vperm.xlu2 %352, %v121_v26  }
  0x24   :  { %157 = vperm.xlu1 %341, %v123_v30   ;;  %152 = vperm.xlu0 %330, %v122_v31  }
  0x26   :  { %162 = vperm.xlu2 %352, %v124_v32  }
  0x68   :  { %v128_v34 = vpop.permute.xlu2 %127 }
  0x70   :  { %v133_v45 = vpop.permute.xlu2 %132 }
  0x78   :  { %v148_v9 = vpop.permute.xlu2 %147 }
  0x7e   :  { %v344_v35 = vpop.permute.xlu1 %343  ;;  %v333_v37 = vpop.permute.xlu0 %332 }
  0x7f   :  { %v346_v40 = vunpack.i.h.bf16 %v344_v35  ;;  %v345_v41 = vunpack.i.l.bf16 %v344_v35  ;;  %v335_v42 = vunpack.i.h.bf16 %v333_v37  ;;  %v334_v43 = vunpack.i.l.bf16 %v333_v37 }
  0x81   :  { %v105_v46 = vmul.f32 %v345_v41, %v41_v36  ;;  %v101_v47 = vmul.f32 %v334_v43, %v37_v38  ;;  %v102_v48 = vmul.f32 %v335_v42, %v38_v39  ;;  %v106_v50 = vmul.f32 %v346_v40, %v42_v44 }
  0x83   :  { %v174_v51 = vadd.f32 %v102_v48, %v101_v47  ;;  %v188_v52 = vadd.f32 %v106_v50, %v105_v46  ;;  %v165_v59 = vadd.f32 %v128_v34, %v101_v47  ;;  %v166_v0 = vadd.f32 %v133_v45, %v102_v48  ;;  %v163_v34 = vpop.permute.xlu2 %162 }
  0x84   :  { %v169_v41 = vadd.f32 %v148_v9, %v105_v46 }
  0x85   :  { %v175_v53 = vrot.slane %v174_v51, 4  ;;  %v189_v58 = vrot.slane %v188_v52, 4  ;;  %v216_v12 = vmax.f32 %v165_v59, %v166_v0 }
  0x86   :  { %v349_v54 = vpop.permute.xlu1 %348  ;;  %v338_v56 = vpop.permute.xlu0 %337 }
  0x87   :  { %v351_v60 = vunpack.i.h.bf16 %v349_v54  ;;  %v350_v61 = vunpack.i.l.bf16 %v349_v54  ;;  %v176_v1 = vadd.f32 %v175_v53, %v174_v51  ;;  %v340_v2 = vunpack.i.h.bf16 %v338_v56 }
  0x88   :  { %v339_v3 = vunpack.i.l.bf16 %v338_v56  ;;  %v190_v6 = vadd.f32 %v189_v58, %v188_v52  ;;  %v217_v22 = vrot.slane %v216_v12, 4 }
  0x89   :  { %v108_v4 = vmul.f32 %v351_v60, %v44_v55  ;;  %v107_v5 = vmul.f32 %v350_v61, %v43_v57  ;;  %v104_v7 = vmul.f32 %v340_v2, %v40_v62  ;;  %v177_v11 = vrot.slane %v176_v1, 2  ;;  %v173_v57 = vld [vmem:[#allocation2] sm:$0xf] }
  0x8a   :  { %v103_v8 = vmul.f32 %v339_v3, %v39_v63  ;;  %v191_v15 = vrot.slane %v190_v6, 2  ;;  %v218_v31 = vmax.f32 %v216_v12, %v217_v22 }
  0x8b   :  { %v195_v10 = vadd.f32 %v108_v4, %v107_v5  ;;  %v178_v21 = vadd.f32 %v177_v11, %v176_v1  ;;  %v172_v44 = vadd.f32 %v163_v34, %v108_v4 }
  0x8c   :  { %v181_v13 = vadd.f32 %v104_v7, %v103_v8  ;;  %v192_v26 = vadd.f32 %v191_v15, %v190_v6  ;;  %v219_v48 = vrot.slane %v218_v31, 2 }
  0x8d   :  { %v196_v14 = vrot.slane %v195_v10, 4  ;;  %v179_v30 = vrot.slane %v178_v21, 1 }
  0x8e   :  { %v143_v16 = vpop.permute.xlu1 %142  ;;  %v138_v17 = vpop.permute.xlu0 %137  ;;  %v182_v18 = vrot.slane %v181_v13, 4  ;;  %v193_v36 = vrot.slane %v192_v26, 1  ;;  %v220_v60 = vmax.f32 %v218_v31, %v219_v48 }
  0x8f   :  { %v168_v19 = vadd.f32 %v143_v16, %v104_v7  ;;  %v167_v20 = vadd.f32 %v138_v17, %v103_v8  ;;  %v197_v24 = vadd.f32 %v196_v14, %v195_v10  ;;  %v180_v47 = vadd.f32 %v179_v30, %v178_v21 }
  0x90   :  { %v183_v23 = vadd.f32 %v182_v18, %v181_v13  ;;  %v194_v52 = vadd.f32 %v193_v36, %v192_v26  ;;  %v221_v3 = vrot.slane %v220_v60, 1  ;;  %v215_v13 = vld [vmem:[#allocation3] sm:$0xf] }
  0x91   :  { %v223_v25 = vmax.f32 %v167_v20, %v168_v19  ;;  %v198_v28 = vrot.slane %v197_v24, 2 }
  0x92   :  { %v184_v27 = vrot.slane %v183_v23, 2  ;;  %v222_v9 = vmax.f32 %v220_v60, %v221_v3 }
  0x93   :  { %v224_v29 = vrot.slane %v223_v25, 4  ;;  %v199_v33 = vadd.f32 %v198_v28, %v197_v24 }
  0x94   :  { %v185_v32 = vadd.f32 %v184_v27, %v183_v23 }
  0x95   :  { %v225_v35 = vmax.f32 %v223_v25, %v224_v29  ;;  %v200_v39 = vrot.slane %v199_v33, 1 }
  0x96   :  { %v186_v37 = vrot.slane %v185_v32, 1  ;;  %v158_v38 = vpop.permute.xlu1 %157  ;;  %v153_v40 = vpop.permute.xlu0 %152 }
  0x97   :  { %v226_v42 = vrot.slane %v225_v35, 2  ;;  %v171_v43 = vadd.f32 %v158_v38, %v107_v5  ;;  %v170_v45 = vadd.f32 %v153_v40, %v106_v50  ;;  %v201_v56 = vadd.f32 %v200_v39, %v199_v33 }
  0x98   :  { %v187_v49 = vadd.f32 %v186_v37, %v185_v32 }
  0x99   :  { %v237_v51 = vmax.f32 %v171_v43, %v172_v44  ;;  %v230_v53 = vmax.f32 %v169_v41, %v170_v45  ;;  %v227_v55 = vmax.f32 %v225_v35, %v226_v42 }
  0x9a   :  { %v207_v54 = vsel %vm206_vm0, %v187_v49, %v180_v47 }
  0x9b   :  { %v238_v58 = vrot.slane %v237_v51, 4  ;;  %v209_v46 = vsel %vm208_vm1, %v194_v52, %v207_v54  ;;  %v231_v59 = vrot.slane %v230_v53, 4  ;;  %v228_v0 = vrot.slane %v227_v55, 1 }
  0x9c   :  { %v211_v50 = vsel %vm210_vm2, %v201_v56, %v209_v46 }
  0x9d   :  { %v239_v61 = vmax.f32 %v237_v51, %v238_v58  ;;  %v213_v62 = vadd.f32 %v211_v50, %v173_v57  ;;  %v232_v63 = vmax.f32 %v230_v53, %v231_v59  ;;  %v229_v6 = vmax.f32 %v227_v55, %v228_v0 }
  0x9f   :  { %v240_v1 = vrot.slane %v239_v61, 2  ;;  %214 = vst [vmem:[#allocation2] sm:$0xf] %v213_v62  ;;  %v233_v2 = vrot.slane %v232_v63, 2  ;;  %v248_v12 = vsel %vm206_vm0, %v229_v6, %v222_v9 }
  0xa1   :  { %v241_v4 = vmax.f32 %v239_v61, %v240_v1  ;;  %v234_v5 = vmax.f32 %v232_v63, %v233_v2 }
  0xa3   :  { %v242_v7 = vrot.slane %v241_v4, 1  ;;  %v235_v8 = vrot.slane %v234_v5, 1 }
  0xa5   :  { %v243_v10 = vmax.f32 %v241_v4, %v242_v7  ;;  %v236_v11 = vmax.f32 %v234_v5, %v235_v8 }
  0xa6   :  { %v257_v14 = vld [vmem:[#allocation2] sm:$0xf] }
  0xa7   :  { %v249_v15 = vsel %vm208_vm1, %v236_v11, %v248_v12  ;;  %v258_v16 = vmul.f32 0.0625, %v257_v14 }
  0xa8   :  { %v250_v17 = vsel %vm210_vm2, %v243_v10, %v249_v15 }
  0xa9   :  { %v252_v18 = vmax.f32 %v215_v13, %v250_v17  ;;  %259 = vst [vmem:[#allocation7] sm:$0xf] %v258_v16 }
  0xaa   :  { %272 = dma.vmem_to_hbm [thread:$0]  %s268_s26, 64, %s270_s29, [#allocation6]  }
  0xab   :  { %253 = vst [vmem:[#allocation3] sm:$0xf] %v252_v18 }
  0xb2   :  { %v260_v19 = vld [vmem:[#allocation3] sm:$0xf] }
  0xb3   :  { %261 = vst [vmem:[#allocation8] sm:$0xf] %v260_v19 }
  0xb4   :  { %283 = dma.vmem_to_hbm [thread:$0]  %s279_s4, 64, %s281_s6, [#allocation9]  }
  0xb5   :  { %427 = dma.done.wait [#allocation6], 64  }
  0xb6   :  { %428 = vsyncadd [#allocation6], 4294967232 }
  0xb7   :  { %429 = dma.done.wait [#allocation9], 64  }
  0xb8   :  { %430 = vsyncadd [#allocation9], 4294967232 }
  0xb9   :  { %292 = vsyncpa [#allocation5], 1 }
  0xba   :  { %293 = vsyncpa [#allocation6], 1 }
  0xbb   :  { %294 = vsyncpa [#allocation9], 1 }

</bundles_post_ra>
